<compile_context>
chip_gen: v7x
topology: tpu7x:2x2x1
jax: 0.10.0
libtpu: 0.0.40
codegen_flags: <defaults>
</compile_context>

<pallas_src>
import jax
import jax.numpy as jnp
from jax.experimental import pallas as pl
from jax.experimental.pallas import tpu as pltpu


# ---------------------------------------------------------------------------
# Pallas kernel: one (tm, lanes) tile of  out = a + b
# ---------------------------------------------------------------------------
def _add_kernel(a_ref, b_ref, o_ref):
    o_ref[...] = (a_ref[...] + b_ref[...]).astype(o_ref.dtype)


_LANE = 128
_TARGET_BLOCK_BYTES = 4 * 1024 * 1024   # ~4 MiB per operand per block


def _sublane_multiple(itemsize):
    # f32 -> 8 rows/vreg, bf16 -> 16, int8/fp8 -> 32 (packed sublanes)
    return {4: 8, 2: 16, 1: 32}.get(itemsize, 8)


def _choose_layout(total, itemsize):
    """Pick (lanes, rows, tm) for a lane-dense (rows, lanes) slab.

    Requires total % 128 == 0.
    """
    lanes = _LANE
    for cand in (1024, 512, 256, 128):   # prefer wider lane-dense slabs
        if total % cand == 0:
            lanes = cand
            break
    rows = total // lanes
    sub = _sublane_multiple(itemsize)

    # Target ~4 MiB per operand per block, rounded to the sublane multiple.
    tm = max(sub, (_TARGET_BLOCK_BYTES // (lanes * itemsize)) // sub * sub)

    if tm >= rows:
        if rows >= 2 * sub:
            # Force >=2 grid steps so both v7x TensorCores get work
            # (near-zero effect on 1-TC v5e/v6e).
            tm = (((rows + 1) // 2 + sub - 1) // sub) * sub
        else:
            # Tiny array: single full-extent block (block == full array dims,
            # so the (8,128) divisibility rule does not apply).
            tm = rows
    return lanes, rows, tm


@jax.jit
def _add2_pallas(a, b):
    assert a.shape == b.shape, "Add2 operands must have identical shapes"
    orig_shape = a.shape
    out_dtype = jnp.result_type(a.dtype, b.dtype)
    total = a.size

    af = a.reshape(-1)
    bf = b.reshape(-1)

    # Rare fallback: only the sub-lane tail (total % 128) is padded.  For
    # typical NN tensors total % 128 == 0 and this path is never taken, so the
    # wrapper adds zero extra HBM traffic.
    padded_total = pl.cdiv(total, _LANE) * _LANE
    has_tail = padded_total != total
    if has_tail:
        pad = padded_total - total
        af = jnp.pad(af, (0, pad))
        bf = jnp.pad(bf, (0, pad))

    itemsize = max(
        jnp.dtype(a.dtype).itemsize,
        jnp.dtype(b.dtype).itemsize,
        jnp.dtype(out_dtype).itemsize,
    )
    lanes, rows, tm = _choose_layout(padded_total, itemsize)

    a2 = af.reshape(rows, lanes)          # contiguous reshape: bitcast, no copy
    b2 = bf.reshape(rows, lanes)

    bytes_accessed = (
        padded_total * jnp.dtype(a.dtype).itemsize
        + padded_total * jnp.dtype(b.dtype).itemsize
        + padded_total * jnp.dtype(out_dtype).itemsize
    )

    out = pl.pallas_call(
        _add_kernel,
        out_shape=jax.ShapeDtypeStruct((rows, lanes), out_dtype),
        grid_spec=pltpu.PrefetchScalarGridSpec(
            num_scalar_prefetch=0,
            # Partial last block is read-padded / write-masked by Pallas, so no
            # row padding is needed.
            grid=(pl.cdiv(rows, tm),),
            in_specs=[
                pl.BlockSpec((tm, lanes), lambda i: (i, 0)),
                pl.BlockSpec((tm, lanes), lambda i: (i, 0)),
            ],
            out_specs=pl.BlockSpec((tm, lanes), lambda i: (i, 0)),
        ),
        compiler_params=pltpu.CompilerParams(
            dimension_semantics=("parallel",),
            # 48 MiB: ample for 6 x ~4 MiB double-buffered tiles, raises v5e's
            # 16 MiB default, and leaves headroom under v7x's 64 MiB physical.
            vmem_limit_bytes=48 * 1024 * 1024,
        ),
        cost_estimate=pl.CostEstimate(
            flops=total,
            transcendentals=0,
            bytes_accessed=bytes_accessed,
        ),
    )(a2, b2)

    out = out.reshape(-1)
    if has_tail:
        out = out[:total]
    return out.reshape(orig_shape)


# ---------------------------------------------------------------------------
# Module-level wrapper mirroring the PyTorch Add2 forward semantics
# ---------------------------------------------------------------------------
class Add2:
    """y = x[0] + x[1][index]  (index is a static construction-time choice)."""

    def __init__(self, c1, index):
        self.index = index  # c1 is unused, matching the PyTorch module

    def __call__(self, x):
        if self.index == 0:
            return _add2_pallas(x[0], x[1][0])
        elif self.index == 1:
            return _add2_pallas(x[0], x[1][1])
        raise ValueError("Add2.index must be 0 or 1")


if __name__ == "__main__":
    key = jax.random.PRNGKey(0)
    k0, k1, k2 = jax.random.split(key, 3)

    shape = (2, 4, 16, 16)  # small NCHW feature map, matching module usage
    x0 = jax.random.normal(k0, shape, dtype=jnp.float32)
    x1a = jax.random.normal(k1, shape, dtype=jnp.float32)
    x1b = jax.random.normal(k2, shape, dtype=jnp.float32)

    inputs = [x0, (x1a, x1b)]

    out0 = jax.block_until_ready(Add2(c1=4, index=0)(inputs))
    out1 = jax.block_until_ready(Add2(c1=4, index=1)(inputs))

    ref0 = x0 + x1a
    ref1 = x0 + x1b

    assert out0.shape == shape and out1.shape == shape
    assert out0.dtype == ref0.dtype
    assert jnp.max(jnp.abs(out0 - ref0)) < 1e-6, "mismatch for index=0"
    assert jnp.max(jnp.abs(out1 - ref1)) < 1e-6, "mismatch for index=1"

    print("KERNEL_OK")
</pallas_src>

<mosaic_0001>
module attributes {stable_mosaic.version = 11 : i64} {
  func.func @_add_kernel(%arg0: i32, %arg1: memref<2x1024xf32, #tpu.memory_space<vmem>>, %arg2: memref<2x1024xf32, #tpu.memory_space<vmem>>, %arg3: memref<2x1024xf32, #tpu.memory_space<vmem>>) attributes {dimension_semantics = [#tpu.dimension_semantics<parallel>], iteration_bounds = array<i64: 1>, scalar_prefetch = 0 : i64, scratch_operands = 0 : i64, tpu.core_type = #tpu.core_type<tc>, window_params = [{transform_indices = @transform_0, window_bounds = array<i64: 2, 1024>}, {transform_indices = @transform_1, window_bounds = array<i64: 2, 1024>}, {transform_indices = @transform_2, window_bounds = array<i64: 2, 1024>}]} {
    %c0 = arith.constant 0 : index
    %c0_0 = arith.constant 0 : index
    %0 = vector.load %arg1[%c0, %c0_0] : memref<2x1024xf32, #tpu.memory_space<vmem>>, vector<2x1024xf32>
    %c0_1 = arith.constant 0 : index
    %c0_2 = arith.constant 0 : index
    %1 = vector.load %arg2[%c0_1, %c0_2] : memref<2x1024xf32, #tpu.memory_space<vmem>>, vector<2x1024xf32>
    %2 = arith.addf %0, %1 : vector<2x1024xf32>
    %c0_3 = arith.constant 0 : index
    %c0_4 = arith.constant 0 : index
    %3 = vector.load %arg3[%c0_3, %c0_4] : memref<2x1024xf32, #tpu.memory_space<vmem>>, vector<2x1024xf32>
    tpu.vector_store %arg3[%c0_3, %c0_4], %2 {strides = array<i32>} : memref<2x1024xf32, #tpu.memory_space<vmem>>, vector<2x1024xf32>,
    return
  }
  func.func @transform_0(%arg0: i32) -> (i32, i32) {
    %c0_i32 = arith.constant 0 : i32
    %c0_i32_0 = arith.constant 0 : i32
    return %arg0, %c0_i32 : i32, i32
  }
  func.func @transform_1(%arg0: i32) -> (i32, i32) {
    %c0_i32 = arith.constant 0 : i32
    %c0_i32_0 = arith.constant 0 : i32
    return %arg0, %c0_i32 : i32, i32
  }
  func.func @transform_2(%arg0: i32) -> (i32, i32) {
    %c0_i32 = arith.constant 0 : i32
    %c0_i32_0 = arith.constant 0 : i32
    return %arg0, %c0_i32 : i32, i32
  }
}

</mosaic_0001>

<bundles_post_ra>
// kernel: _add2_pallas.1
= control target key start
LH: loop header
LB: loop body
LE: loop exit
PB: predicated region body
PF: predicated region fallthrough
CT: control target
= control target key end

     0   :  { %s56_s0 = inlined_call_operand.vmem [shape: f32[2,1024], index: 0, kind: input, shape index: {}]   ;;  %s57_s1 = inlined_call_operand.vmem [shape: f32[2,1024], index: 1, kind: input, shape index: {}]   ;;  %s58_s2 = inlined_call_operand.vmem [shape: f32[2,1024], index: 2, kind: output, shape index: {}]  }
   0x1   :  { %v11_v0 = vld [vmem:[%s56_s0] sm:$0xff]  ;;  %v12_v2 = vld [vmem:[%s56_s0 + $0x8] sm:$0xff] }
   0x2   :  { %v13_v1 = vld [vmem:[%s57_s1] sm:$0xff]  ;;  %v14_v4 = vld [vmem:[%s57_s1 + $0x8] sm:$0xff] }
   0x3   :  { %v15_v3 = vadd.f32 %v13_v1, %v11_v0  ;;  %v16_v5 = vadd.f32 %v14_v4, %v12_v2 }
   0x5   :  { %17 = vst [vmem:[%s58_s2] sm:$0xff] %v15_v3  ;;  %18 = vst [vmem:[%s58_s2 + $0x8] sm:$0xff] %v16_v5 }

</bundles_post_ra>
